<compile_context>
chip_gen: v5e
topology: v5e:2x2
jax: 0.10.0
libtpu: 0.0.40
codegen_flags: <defaults>
</compile_context>

<pallas_src>
import functools

import jax
import jax.numpy as jnp
from jax.experimental import pallas as pl
from jax.experimental.pallas import tpu as pltpu


def _round_up(x, m):
    return (x + m - 1) // m * m


def _linear_kernel_single_k(x_ref, wt_ref, o_ref):
    # Whole contraction dim in one block: single dot, direct store.
    o_ref[...] = jax.lax.dot_general(
        x_ref[...],
        wt_ref[...],
        dimension_numbers=(((1,), (0,)), ((), ())),
        preferred_element_type=jnp.float32,
    ).astype(o_ref.dtype)


def _linear_kernel_multi_k(x_ref, wt_ref, o_ref):
    # o_ref is f32 and resident across the k axis (its index_map ignores k),
    # so accumulate directly into it -- no VMEM scratch, no final copy.
    @pl.when(pl.program_id(2) == 0)
    def _():
        o_ref[...] = jnp.zeros_like(o_ref)

    o_ref[...] += jax.lax.dot_general(
        x_ref[...],
        wt_ref[...],
        dimension_numbers=(((1,), (0,)), ((), ())),
        preferred_element_type=jnp.float32,
    )


@functools.partial(
    jax.jit,
    static_argnames=("use_fast_path", "use_bf16", "tile_m", "tile_n", "tile_k"),
)
def mynet_forward(x, w, *, use_fast_path=True, use_bf16=False,
                  tile_m=512, tile_n=512, tile_k=1024):
    """Pallas equivalent of myNet.forward: out = x @ W.T (no bias)."""
    if x.dtype != w.dtype:
        raise ValueError(f"x/w dtype mismatch: {x.dtype} vs {w.dtype}")
    assert tile_m % 8 == 0 and tile_n % 128 == 0 and tile_k % 128 == 0
    if use_bf16:
        assert tile_m % 16 == 0  # bf16 (16, 128) minimum tile

    m, d_in = x.shape
    d_out, d_in_w = w.shape
    assert d_in == d_in_w
    out_dtype = x.dtype

    if use_bf16:
        x = x.astype(jnp.bfloat16)
        w = w.astype(jnp.bfloat16)

    # Small-problem fast path: the whole matmul fits in one tile, so XLA's
    # native dot beats pad/pallas_call/slice dispatch overhead outright.
    if use_fast_path and m <= tile_m and d_out <= tile_n and d_in <= tile_k:
        return jnp.dot(
            x, w.T,
            preferred_element_type=jnp.float32,
            precision=jax.lax.Precision.HIGHEST,
        ).astype(out_dtype)

    # One-time transpose in the wrapper: kernel consumes W as (in, out).
    w_t = w.T

    # --- Tile / grid selection ---------------------------------------------
    # M: never padded; ragged last block is fine (OOB rows never written).
    tm = m if m <= tile_m else tile_m
    grid_m = int(pl.cdiv(m, tm))

    # N: padded only up to one 128-lane tile when tiny (lane-dense stores);
    # otherwise unpadded, ragged last block.
    if d_out < 128:
        n_pad, tn = 128, 128
    elif d_out <= tile_n:
        n_pad, tn = d_out, d_out
    else:
        n_pad, tn = d_out, tile_n
    grid_n = int(pl.cdiv(n_pad, tn))

    # K: zero-padded only when tiny (<128) or when split across the k grid
    # axis (required for a correct reduction -- padded products are zero).
    if d_in < 128:
        k_pad, tk = 128, 128
    elif d_in <= tile_k:
        k_pad, tk = d_in, d_in
    else:
        tk = tile_k
        k_pad = _round_up(d_in, tile_k)
    grid_k = int(k_pad // tk)

    if k_pad != d_in:
        x = jnp.pad(x, ((0, 0), (0, k_pad - d_in)))
        w_t = jnp.pad(w_t, ((0, k_pad - d_in), (0, 0)))
    if n_pad != d_out:
        w_t = jnp.pad(w_t, ((0, 0), (0, n_pad - d_out)))

    grid = (grid_m, grid_n, grid_k)
    kernel = _linear_kernel_single_k if grid_k == 1 else _linear_kernel_multi_k

    itemsize = jnp.dtype(x.dtype).itemsize
    cost = pl.CostEstimate(
        flops=int(2 * m * n_pad * k_pad),
        transcendentals=0,
        # x is re-read once per j block, W once per i block.
        bytes_accessed=int(
            (m * k_pad * grid_n + k_pad * n_pad * grid_m) * itemsize
            + m * n_pad * 4
        ),
    )

    out_p = pl.pallas_call(
        kernel,
        out_shape=jax.ShapeDtypeStruct((m, n_pad), jnp.float32),
        grid=grid,
        in_specs=[
            pl.BlockSpec((tm, tk), lambda i, j, kb: (i, kb)),   # x tile
            pl.BlockSpec((tk, tn), lambda i, j, kb: (kb, j)),   # W.T tile (in, out)
        ],
        out_specs=pl.BlockSpec((tm, tn), lambda i, j, kb: (i, j)),
        compiler_params=pltpu.CompilerParams(
            dimension_semantics=("parallel", "parallel", "arbitrary"),
            vmem_limit_bytes=32 * 1024 * 1024,
        ),
        cost_estimate=cost,
    )(x, w_t)

    out = out_p if n_pad == d_out else out_p[:, :d_out]
    return out.astype(out_dtype)


if __name__ == "__main__":
    key = jax.random.PRNGKey(0)
    k1, k2, k3, k4 = jax.random.split(key, 4)

    # --- Module-default size: myNet(tr_size=3) on a small batch of points ---
    tr_size, n_points = 3, 16
    bound = 1.0 / float(jnp.sqrt(jnp.float32(tr_size)))
    w = jax.random.uniform(k1, (tr_size, tr_size), jnp.float32, -bound, bound)
    x = jax.random.normal(k2, (n_points, tr_size), jnp.float32)
    ref = jnp.dot(x, w.T, precision=jax.lax.Precision.HIGHEST)

    # Force the Pallas kernel (fast path off) so the kernel itself runs on TPU.
    out_pallas = jax.block_until_ready(mynet_forward(x, w, use_fast_path=False))
    assert out_pallas.shape == (n_points, tr_size)
    assert jnp.allclose(out_pallas, ref, atol=1e-5, rtol=1e-5)

    # Default call: tiny problem routes through XLA's dot (overhead-bound).
    out_fast = jax.block_until_ready(mynet_forward(x, w))
    assert jnp.allclose(out_fast, ref, atol=1e-5, rtol=1e-5)

    # --- Larger myNet(tr_size=200): exercise tiled multi-K / ragged blocks ---
    tr2, n2 = 200, 80
    bound2 = 1.0 / float(jnp.sqrt(jnp.float32(tr2)))
    w2 = jax.random.uniform(k3, (tr2, tr2), jnp.float32, -bound2, bound2)
    x2 = jax.random.normal(k4, (n2, tr2), jnp.float32)
    ref2 = jnp.dot(x2, w2.T, precision=jax.lax.Precision.HIGHEST)

    out2 = jax.block_until_ready(
        mynet_forward(x2, w2, use_fast_path=False,
                      tile_m=64, tile_n=128, tile_k=128)
    )
    assert out2.shape == (n2, tr2)
    assert jnp.allclose(out2, ref2, atol=1e-4, rtol=1e-4)

    # bf16 inputs / f32 accumulation path (v6e/v7x large-size recommendation).
    ref2_bf16 = jnp.dot(
        x2.astype(jnp.bfloat16).astype(jnp.float32),
        w2.astype(jnp.bfloat16).astype(jnp.float32).T,
        precision=jax.lax.Precision.HIGHEST,
    )
    out2_bf16 = jax.block_until_ready(
        mynet_forward(x2, w2, use_fast_path=False, use_bf16=True,
                      tile_m=64, tile_n=128, tile_k=128)
    )
    assert jnp.allclose(out2_bf16, ref2_bf16, atol=1e-3, rtol=1e-3)

    print("KERNEL_OK")
</pallas_src>

<mosaic_0001>
module attributes {stable_mosaic.version = 11 : i64} {
  func.func @_linear_kernel_single_k(%arg0: i32, %arg1: i32, %arg2: i32, %arg3: memref<16x128xf32, #tpu.memory_space<vmem>>, %arg4: memref<128x128xf32, #tpu.memory_space<vmem>>, %arg5: memref<16x128xf32, #tpu.memory_space<vmem>>) attributes {dimension_semantics = [#tpu.dimension_semantics<parallel>, #tpu.dimension_semantics<parallel>, #tpu.dimension_semantics<arbitrary>], iteration_bounds = array<i64: 1, 1, 1>, scalar_prefetch = 0 : i64, scratch_operands = 0 : i64, tpu.core_type = #tpu.core_type<tc>, window_params = [{transform_indices = @transform_0, window_bounds = array<i64: 16, 128>}, {transform_indices = @transform_1, window_bounds = array<i64: 128, 128>}, {transform_indices = @transform_2, window_bounds = array<i64: 16, 128>}]} {
    %c0 = arith.constant 0 : index
    %c0_0 = arith.constant 0 : index
    %0 = vector.load %arg3[%c0, %c0_0] : memref<16x128xf32, #tpu.memory_space<vmem>>, vector<16x128xf32>
    %c0_1 = arith.constant 0 : index
    %c0_2 = arith.constant 0 : index
    %1 = vector.load %arg4[%c0_1, %c0_2] : memref<128x128xf32, #tpu.memory_space<vmem>>, vector<128x128xf32>
    %cst = arith.constant dense<0.000000e+00> : vector<16x128xf32>
    %2 = tpu.matmul %0, %1, %cst {dimension_numbers = #tpu.dot_dimension_numbers<[1], [0], [0], [1], [0, 0, 1, 1], [], []>} : vector<16x128xf32>, vector<128x128xf32>, vector<16x128xf32> -> vector<16x128xf32>
    %c0_3 = arith.constant 0 : index
    %c0_4 = arith.constant 0 : index
    %3 = vector.load %arg5[%c0_3, %c0_4] : memref<16x128xf32, #tpu.memory_space<vmem>>, vector<16x128xf32>
    tpu.vector_store %arg5[%c0_3, %c0_4], %2 {strides = array<i32>} : memref<16x128xf32, #tpu.memory_space<vmem>>, vector<16x128xf32>,
    return
  }
  func.func @transform_0(%arg0: i32, %arg1: i32, %arg2: i32) -> (i32, i32) {
    %c0_i32 = arith.constant 0 : i32
    return %arg0, %arg2 : i32, i32
  }
  func.func @transform_1(%arg0: i32, %arg1: i32, %arg2: i32) -> (i32, i32) {
    %c0_i32 = arith.constant 0 : i32
    return %arg2, %arg1 : i32, i32
  }
  func.func @transform_2(%arg0: i32, %arg1: i32, %arg2: i32) -> (i32, i32) {
    %c0_i32 = arith.constant 0 : i32
    return %arg0, %arg1 : i32, i32
  }
}

</mosaic_0001>

<bundles_post_ra>
// kernel: mynet_forward.1
= control target key start
LH: loop header
LB: loop body
LE: loop exit
PB: predicated region body
PF: predicated region fallthrough
CT: control target
= control target key end

     0   :  { %s149_s1 = inlined_call_operand.vmem [shape: f32[128,128], index: 1, kind: input, shape index: {}]   ;;  %s150_s0 = inlined_call_operand.vmem [shape: f32[16,128], index: 0, kind: input, shape index: {}]   ;;  %s151_s2 = inlined_call_operand.vmem [shape: f32[16,128], index: 2, kind: output, shape index: {}]  }
   0x1   :  { %v28_v0 = vld [vmem:[%s149_s1 + $0x78] sm:$0xff]  ;;  %v27_v1 = vld [vmem:[%s149_s1 + $0x70] sm:$0xff]  ;;  %v26_v2 = vld [vmem:[%s149_s1 + $0x68] sm:$0xff] }
   0x2   :  { %29 = vmatpush.msra.mxu0 %v28_v0  ;;  %58 = vmatpush.msra.mxu1 %v28_v0  ;;  %v25_v3 = vld [vmem:[%s149_s1 + $0x60] sm:$0xff]  ;;  %v24_v4 = vld [vmem:[%s149_s1 + $0x58] sm:$0xff]  ;;  %v23_v5 = vld [vmem:[%s149_s1 + $0x50] sm:$0xff] }
   0x3   :  { %v22_v6 = vld [vmem:[%s149_s1 + $0x48] sm:$0xff]  ;;  %v21_v7 = vld [vmem:[%s149_s1 + $0x40] sm:$0xff]  ;;  %v20_v8 = vld [vmem:[%s149_s1 + $0x38] sm:$0xff] }
   0x4   :  { %30 = vmatpush.msra.mxu0 %v27_v1  ;;  %59 = vmatpush.msra.mxu1 %v27_v1  ;;  %v19_v9 = vld [vmem:[%s149_s1 + $0x30] sm:$0xff]  ;;  %v18_v10 = vld [vmem:[%s149_s1 + $0x28] sm:$0xff]  ;;  %v17_v11 = vld [vmem:[%s149_s1 + $0x20] sm:$0xff] }
   0x5   :  { %v16_v12 = vld [vmem:[%s149_s1 + $0x18] sm:$0xff]  ;;  %v15_v13 = vld [vmem:[%s149_s1 + $0x10] sm:$0xff]  ;;  %v14_v14 = vld [vmem:[%s149_s1 + $0x8] sm:$0xff] }
   0x6   :  { %31 = vmatpush.msra.mxu0 %v26_v2  ;;  %60 = vmatpush.msra.mxu1 %v26_v2  ;;  %v13_v15 = vld [vmem:[%s149_s1] sm:$0xff]  ;;  %v12_v17 = vld [vmem:[%s150_s0 + $0x8] sm:$0xff] }
   0x7   :  { %v11_v16 = vld [vmem:[%s150_s0] sm:$0xff] }
   0x8   :  { %32 = vmatpush.msra.mxu0 %v25_v3  ;;  %61 = vmatpush.msra.mxu1 %v25_v3 }
   0xa   :  { %33 = vmatpush.msra.mxu0 %v24_v4  ;;  %62 = vmatpush.msra.mxu1 %v24_v4 }
   0xc   :  { %34 = vmatpush.msra.mxu0 %v23_v5  ;;  %63 = vmatpush.msra.mxu1 %v23_v5 }
   0xe   :  { %35 = vmatpush.msra.mxu0 %v22_v6  ;;  %64 = vmatpush.msra.mxu1 %v22_v6 }
  0x10   :  { %36 = vmatpush.msra.mxu0 %v21_v7  ;;  %65 = vmatpush.msra.mxu1 %v21_v7 }
  0x12   :  { %37 = vmatpush.msra.mxu0 %v20_v8  ;;  %66 = vmatpush.msra.mxu1 %v20_v8 }
  0x14   :  { %38 = vmatpush.msra.mxu0 %v19_v9  ;;  %67 = vmatpush.msra.mxu1 %v19_v9 }
  0x16   :  { %39 = vmatpush.msra.mxu0 %v18_v10  ;;  %68 = vmatpush.msra.mxu1 %v18_v10 }
  0x18   :  { %40 = vmatpush.msra.mxu0 %v17_v11  ;;  %69 = vmatpush.msra.mxu1 %v17_v11 }
  0x1a   :  { %41 = vmatpush.msra.mxu0 %v16_v12  ;;  %70 = vmatpush.msra.mxu1 %v16_v12 }
  0x1c   :  { %42 = vmatpush.msra.mxu0 %v15_v13  ;;  %71 = vmatpush.msra.mxu1 %v15_v13 }
  0x1e   :  { %43 = vmatpush.msra.mxu0 %v14_v14  ;;  %72 = vmatpush.msra.mxu1 %v14_v14 }
  0x20   :  { %44 = vmatpush.msra.mxu0 %v13_v15  ;;  %73 = vmatpush.msra.mxu1 %v13_v15 }
  0x21   :  { %45 = vmatmul.f32.vlgmr.msra.gmra.mxu0 %v11_v16  ;;  %48 = vmatmul.f32.vlgmr.msra.gmra.mxu1 %v12_v17 }
  0x9e   :  { %v46_v18 = vpop.f32.mrf.mxu0  ;;  %v49_v19 = vpop.f32.mrf.mxu1 }
  0x9f   :  { %52 = vst [vmem:[%s151_s2] sm:$0xff] %v46_v18 }
  0xa0   :  { %53 = vst [vmem:[%s151_s2 + $0x8] sm:$0xff] %v49_v19 }

</bundles_post_ra>
